<compile_context>
chip_gen: v7x
topology: tpu7x:2x2x1
jax: 0.10.0
libtpu: 0.0.40
codegen_flags: <defaults>
</compile_context>

<pallas_src>
import math
from functools import partial

import jax
import jax.numpy as jnp
from jax.experimental import pallas as pl
from jax.experimental.pallas import tpu as pltpu

# Logical layer dims of the PyTorch module.
D_IN = 8
D_H1 = 128
D_H2 = 256
D_H3 = 256
D_OUT = 8
D_OUT_PAD = 128          # lane-dense padded output width
DEFAULT_TB_MAX = 1024    # max batch rows per grid step (sweep 512/1024/2048)


def qnet_kernel(x_ref,
                w1_ref, b1_ref,
                w2_ref, b2_ref,
                w3_ref, b3_ref,
                w4_ref, b4_ref,
                o_ref):
    """One batch tile of the forward pass. Weights/biases are whole-array
    VMEM-resident blocks; dots run in bf16 on the MXU with f32 accumulation;
    bias-add and ReLU stay in f32 on the VPU (free VALU slots)."""
    x = x_ref[...].astype(jnp.bfloat16)

    h = jnp.dot(x, w1_ref[...], preferred_element_type=jnp.float32) + b1_ref[...]
    h = jnp.maximum(h, 0.0)

    h = jnp.dot(h.astype(jnp.bfloat16), w2_ref[...],
                preferred_element_type=jnp.float32) + b2_ref[...]
    h = jnp.maximum(h, 0.0)

    h = jnp.dot(h.astype(jnp.bfloat16), w3_ref[...],
                preferred_element_type=jnp.float32) + b3_ref[...]
    h = jnp.maximum(h, 0.0)

    out = jnp.dot(h.astype(jnp.bfloat16), w4_ref[...],
                  preferred_element_type=jnp.float32) + b4_ref[...]
    # Lane-dense (TB, 128) unmasked store; bf16 halves the HBM writeback.
    o_ref[...] = out.astype(o_ref.dtype)


def _resident_spec(shape):
    """Full-array block whose index never changes across the batch grid, so the
    weight/bias DMA happens once and the block stays resident in VMEM."""
    return pl.BlockSpec(shape, lambda i: (0,) * len(shape))


def _choose_tb(batch, tb_max):
    """Pick the batch tile: as large as tb_max, a multiple of 8 (sublanes),
    and — when the batch allows it — at least 2 tiles so both v7x TensorCores
    get work via the 'parallel' batch axis."""
    b8 = -(-batch // 8) * 8                    # batch rounded to sublane multiple
    if b8 >= 2 * tb_max:
        return tb_max                          # plenty of tiles already
    half = -(-b8 // 2)                         # aim for exactly 2 tiles
    tb = -(-half // 8) * 8
    return max(8, min(tb, tb_max))


@partial(jax.jit, static_argnames=("tb_max",))
def qnet_forward(x, params, *, tb_max=DEFAULT_TB_MAX):
    """x: [B, 8] float32; params: dict with w1..w4 ([in,out]) and b1..b4 ([1,out])."""
    B = x.shape[0]
    tb = _choose_tb(B, tb_max)
    b_pad = tb * pl.cdiv(B, tb)

    # Pad batch to a multiple of the tile (zero rows, sliced off afterwards).
    x_p = x if b_pad == B else jnp.pad(x, ((0, b_pad - B), (0, 0)))

    # bf16 MXU operands (weights), f32 biases. Final projection padded to a
    # lane-dense 128-wide output; extra columns are garbage and discarded.
    w1 = params["w1"].astype(jnp.bfloat16)
    w2 = params["w2"].astype(jnp.bfloat16)
    w3 = params["w3"].astype(jnp.bfloat16)
    w4 = jnp.pad(params["w4"], ((0, 0), (0, D_OUT_PAD - D_OUT))).astype(jnp.bfloat16)
    b1 = params["b1"].astype(jnp.float32)
    b2 = params["b2"].astype(jnp.float32)
    b3 = params["b3"].astype(jnp.float32)
    b4 = jnp.pad(params["b4"], ((0, 0), (0, D_OUT_PAD - D_OUT))).astype(jnp.float32)

    args = (x_p, w1, b1, w2, b2, w3, b3, w4, b4)

    in_specs = [
        pl.BlockSpec((tb, D_IN), lambda i: (i, 0)),      # x: tiled over batch
        _resident_spec(w1.shape), _resident_spec(b1.shape),
        _resident_spec(w2.shape), _resident_spec(b2.shape),
        _resident_spec(w3.shape), _resident_spec(b3.shape),
        _resident_spec(w4.shape), _resident_spec(b4.shape),
    ]
    out_spec = pl.BlockSpec((tb, D_OUT_PAD), lambda i: (i, 0))

    flops = 2 * b_pad * (D_IN * D_H1 + D_H1 * D_H2 + D_H2 * D_H3 + D_H3 * D_OUT_PAD)
    bytes_accessed = (
        x_p.size * x_p.dtype.itemsize
        + b_pad * D_OUT_PAD * 2                                   # bf16 output
        + sum(a.size * a.dtype.itemsize for a in args[1:])
    )

    compiler_kwargs = dict(dimension_semantics=("parallel",))     # megacore / 2-TC
    if tb > 2048:
        # Only needed if a caller pushes the tile well past the default scoped
        # VMEM (16 MiB on v5e, 32 MiB on v6e/v7x); the default tb_max fits.
        compiler_kwargs["vmem_limit_bytes"] = 64 * 1024 * 1024

    out_padded = pl.pallas_call(
        qnet_kernel,
        out_shape=jax.ShapeDtypeStruct((b_pad, D_OUT_PAD), jnp.bfloat16),
        grid=(b_pad // tb,),
        in_specs=in_specs,
        out_specs=out_spec,
        compiler_params=pltpu.CompilerParams(**compiler_kwargs),
        cost_estimate=pl.CostEstimate(
            flops=flops, transcendentals=0, bytes_accessed=bytes_accessed),
    )(*args)

    return out_padded[:B, :D_OUT].astype(jnp.float32)


def init_params(key):
    """Deterministic init mimicking PyTorch nn.Linear default:
    U(-1/sqrt(fan_in), 1/sqrt(fan_in)) for both weight and bias."""
    dims = [(D_IN, D_H1), (D_H1, D_H2), (D_H2, D_H3), (D_H3, D_OUT)]
    params = {}
    keys = jax.random.split(key, 2 * len(dims))
    for idx, (fan_in, fan_out) in enumerate(dims):
        bound = 1.0 / math.sqrt(fan_in)
        wk, bk = keys[2 * idx], keys[2 * idx + 1]
        params[f"w{idx + 1}"] = jax.random.uniform(
            wk, (fan_in, fan_out), jnp.float32, minval=-bound, maxval=bound)
        params[f"b{idx + 1}"] = jax.random.uniform(
            bk, (1, fan_out), jnp.float32, minval=-bound, maxval=bound)
    return params


def qnet_reference_bf16(x, params):
    """Pure-JAX reference with the same bf16-operand / f32-accumulate scheme."""
    def mm(a, w):
        return jnp.dot(a.astype(jnp.bfloat16), w.astype(jnp.bfloat16),
                       preferred_element_type=jnp.float32)
    h = jnp.maximum(mm(x, params["w1"]) + params["b1"], 0.0)
    h = jnp.maximum(mm(h, params["w2"]) + params["b2"], 0.0)
    h = jnp.maximum(mm(h, params["w3"]) + params["b3"], 0.0)
    return mm(h, params["w4"]) + params["b4"]


def qnet_reference_f32(x, params):
    """Full-f32 reference of the original PyTorch forward pass."""
    h = jnp.maximum(x @ params["w1"] + params["b1"], 0.0)
    h = jnp.maximum(h @ params["w2"] + params["b2"], 0.0)
    h = jnp.maximum(h @ params["w3"] + params["b3"], 0.0)
    return h @ params["w4"] + params["b4"]


if __name__ == "__main__":
    key = jax.random.PRNGKey(0)
    pkey, xkey = jax.random.split(key)

    params = init_params(pkey)

    # Small batch, not a multiple of the tile: exercises tile clamping,
    # the 2-tile (v7x) path, and the tail-padding path.
    batch = 50
    x = jax.random.normal(xkey, (batch, D_IN), jnp.float32)

    out = jax.block_until_ready(qnet_forward(x, params))
    assert out.shape == (batch, D_OUT)

    ref_bf16 = qnet_reference_bf16(x, params)
    ref_f32 = qnet_reference_f32(x, params)
    assert jnp.allclose(out, ref_bf16, atol=1e-2, rtol=1e-2), "mismatch vs bf16 reference"
    assert jnp.allclose(out, ref_f32, atol=5e-2, rtol=5e-2), "mismatch vs f32 reference"

    print("KERNEL_OK")
</pallas_src>

<mosaic_0001>
module attributes {stable_mosaic.version = 11 : i64} {
  func.func @qnet_kernel(%arg0: i32, %arg1: memref<32x8xf32, #tpu.memory_space<vmem>>, %arg2: memref<8x128xbf16, #tpu.memory_space<vmem>>, %arg3: memref<1x128xf32, #tpu.memory_space<vmem>>, %arg4: memref<128x256xbf16, #tpu.memory_space<vmem>>, %arg5: memref<1x256xf32, #tpu.memory_space<vmem>>, %arg6: memref<256x256xbf16, #tpu.memory_space<vmem>>, %arg7: memref<1x256xf32, #tpu.memory_space<vmem>>, %arg8: memref<256x128xbf16, #tpu.memory_space<vmem>>, %arg9: memref<1x128xf32, #tpu.memory_space<vmem>>, %arg10: memref<32x128xbf16, #tpu.memory_space<vmem>>) attributes {dimension_semantics = [#tpu.dimension_semantics<parallel>], iteration_bounds = array<i64: 2>, scalar_prefetch = 0 : i64, scratch_operands = 0 : i64, tpu.core_type = #tpu.core_type<tc>, window_params = [{transform_indices = @transform_0, window_bounds = array<i64: 32, 8>}, {pipeline_mode = #tpu.pipeline_mode<synchronous>, transform_indices = @transform_1, window_bounds = array<i64: 8, 128>}, {pipeline_mode = #tpu.pipeline_mode<synchronous>, transform_indices = @transform_2, window_bounds = array<i64: 1, 128>}, {pipeline_mode = #tpu.pipeline_mode<synchronous>, transform_indices = @transform_3, window_bounds = array<i64: 128, 256>}, {pipeline_mode = #tpu.pipeline_mode<synchronous>, transform_indices = @transform_4, window_bounds = array<i64: 1, 256>}, {pipeline_mode = #tpu.pipeline_mode<synchronous>, transform_indices = @transform_5, window_bounds = array<i64: 256, 256>}, {pipeline_mode = #tpu.pipeline_mode<synchronous>, transform_indices = @transform_6, window_bounds = array<i64: 1, 256>}, {pipeline_mode = #tpu.pipeline_mode<synchronous>, transform_indices = @transform_7, window_bounds = array<i64: 256, 128>}, {pipeline_mode = #tpu.pipeline_mode<synchronous>, transform_indices = @transform_8, window_bounds = array<i64: 1, 128>}, {transform_indices = @transform_9, window_bounds = array<i64: 32, 128>}]} {
    %c0 = arith.constant 0 : index
    %c0_0 = arith.constant 0 : index
    %0 = vector.load %arg1[%c0, %c0_0] : memref<32x8xf32, #tpu.memory_space<vmem>>, vector<32x8xf32>
    %1 = arith.truncf %0 : vector<32x8xf32> to vector<32x8xbf16>
    %c0_1 = arith.constant 0 : index
    %c0_2 = arith.constant 0 : index
    %2 = vector.load %arg2[%c0_1, %c0_2] : memref<8x128xbf16, #tpu.memory_space<vmem>>, vector<8x128xbf16>
    %cst = arith.constant dense<0.000000e+00> : vector<32x128xf32>
    %3 = tpu.matmul %1, %2, %cst {dimension_numbers = #tpu.dot_dimension_numbers<[1], [0], [0], [1], [0, 0, 1, 1], [], []>} : vector<32x8xbf16>, vector<8x128xbf16>, vector<32x128xf32> -> vector<32x128xf32>
    %c0_3 = arith.constant 0 : index
    %c0_4 = arith.constant 0 : index
    %4 = vector.load %arg3[%c0_3, %c0_4] : memref<1x128xf32, #tpu.memory_space<vmem>>, vector<1x128xf32>
    %5 = vector.broadcast %4 : vector<1x128xf32> to vector<32x128xf32>
    %6 = arith.addf %3, %5 : vector<32x128xf32>
    %cst_5 = arith.constant 0.000000e+00 : f32
    %7 = vector.broadcast %cst_5 : f32 to vector<32x128xf32>
    %8 = arith.maximumf %6, %7 : vector<32x128xf32>
    %9 = arith.truncf %8 : vector<32x128xf32> to vector<32x128xbf16>
    %c0_6 = arith.constant 0 : index
    %c0_7 = arith.constant 0 : index
    %10 = vector.load %arg4[%c0_6, %c0_7] : memref<128x256xbf16, #tpu.memory_space<vmem>>, vector<128x256xbf16>
    %cst_8 = arith.constant dense<0.000000e+00> : vector<32x256xf32>
    %11 = tpu.matmul %9, %10, %cst_8 {dimension_numbers = #tpu.dot_dimension_numbers<[1], [0], [0], [1], [0, 0, 1, 1], [], []>} : vector<32x128xbf16>, vector<128x256xbf16>, vector<32x256xf32> -> vector<32x256xf32>
    %c0_9 = arith.constant 0 : index
    %c0_10 = arith.constant 0 : index
    %12 = vector.load %arg5[%c0_9, %c0_10] : memref<1x256xf32, #tpu.memory_space<vmem>>, vector<1x256xf32>
    %13 = vector.broadcast %12 : vector<1x256xf32> to vector<32x256xf32>
    %14 = arith.addf %11, %13 : vector<32x256xf32>
    %cst_11 = arith.constant 0.000000e+00 : f32
    %15 = vector.broadcast %cst_11 : f32 to vector<32x256xf32>
    %16 = arith.maximumf %14, %15 : vector<32x256xf32>
    %17 = arith.truncf %16 : vector<32x256xf32> to vector<32x256xbf16>
    %c0_12 = arith.constant 0 : index
    %c0_13 = arith.constant 0 : index
    %18 = vector.load %arg6[%c0_12, %c0_13] : memref<256x256xbf16, #tpu.memory_space<vmem>>, vector<256x256xbf16>
    %cst_14 = arith.constant dense<0.000000e+00> : vector<32x256xf32>
    %19 = tpu.matmul %17, %18, %cst_14 {dimension_numbers = #tpu.dot_dimension_numbers<[1], [0], [0], [1], [0, 0, 1, 1], [], []>} : vector<32x256xbf16>, vector<256x256xbf16>, vector<32x256xf32> -> vector<32x256xf32>
    %c0_15 = arith.constant 0 : index
    %c0_16 = arith.constant 0 : index
    %20 = vector.load %arg7[%c0_15, %c0_16] : memref<1x256xf32, #tpu.memory_space<vmem>>, vector<1x256xf32>
    %21 = vector.broadcast %20 : vector<1x256xf32> to vector<32x256xf32>
    %22 = arith.addf %19, %21 : vector<32x256xf32>
    %cst_17 = arith.constant 0.000000e+00 : f32
    %23 = vector.broadcast %cst_17 : f32 to vector<32x256xf32>
    %24 = arith.maximumf %22, %23 : vector<32x256xf32>
    %25 = arith.truncf %24 : vector<32x256xf32> to vector<32x256xbf16>
    %c0_18 = arith.constant 0 : index
    %c0_19 = arith.constant 0 : index
    %26 = vector.load %arg8[%c0_18, %c0_19] : memref<256x128xbf16, #tpu.memory_space<vmem>>, vector<256x128xbf16>
    %cst_20 = arith.constant dense<0.000000e+00> : vector<32x128xf32>
    %27 = tpu.matmul %25, %26, %cst_20 {dimension_numbers = #tpu.dot_dimension_numbers<[1], [0], [0], [1], [0, 0, 1, 1], [], []>} : vector<32x256xbf16>, vector<256x128xbf16>, vector<32x128xf32> -> vector<32x128xf32>
    %c0_21 = arith.constant 0 : index
    %c0_22 = arith.constant 0 : index
    %28 = vector.load %arg9[%c0_21, %c0_22] : memref<1x128xf32, #tpu.memory_space<vmem>>, vector<1x128xf32>
    %29 = vector.broadcast %28 : vector<1x128xf32> to vector<32x128xf32>
    %30 = arith.addf %27, %29 : vector<32x128xf32>
    %31 = arith.truncf %30 : vector<32x128xf32> to vector<32x128xbf16>
    %c0_23 = arith.constant 0 : index
    %c0_24 = arith.constant 0 : index
    %32 = vector.load %arg10[%c0_23, %c0_24] : memref<32x128xbf16, #tpu.memory_space<vmem>>, vector<32x128xbf16>
    tpu.vector_store %arg10[%c0_23, %c0_24], %31 {strides = array<i32>} : memref<32x128xbf16, #tpu.memory_space<vmem>>, vector<32x128xbf16>,
    return
  }
  func.func @transform_0(%arg0: i32) -> (i32, i32) {
    %c0_i32 = arith.constant 0 : i32
    %c0_i32_0 = arith.constant 0 : i32
    return %arg0, %c0_i32 : i32, i32
  }
  func.func @transform_1(%arg0: i32) -> (i32, i32) {
    %c0_i32 = arith.constant 0 : i32
    %c0_i32_0 = arith.constant 0 : i32
    %c0_i32_1 = arith.constant 0 : i32
    return %c0_i32, %c0_i32_0 : i32, i32
  }
  func.func @transform_2(%arg0: i32) -> (i32, i32) {
    %c0_i32 = arith.constant 0 : i32
    %c0_i32_0 = arith.constant 0 : i32
    %c0_i32_1 = arith.constant 0 : i32
    return %c0_i32, %c0_i32_0 : i32, i32
  }
  func.func @transform_3(%arg0: i32) -> (i32, i32) {
    %c0_i32 = arith.constant 0 : i32
    %c0_i32_0 = arith.constant 0 : i32
    %c0_i32_1 = arith.constant 0 : i32
    return %c0_i32, %c0_i32_0 : i32, i32
  }
  func.func @transform_4(%arg0: i32) -> (i32, i32) {
    %c0_i32 = arith.constant 0 : i32
    %c0_i32_0 = arith.constant 0 : i32
    %c0_i32_1 = arith.constant 0 : i32
    return %c0_i32, %c0_i32_0 : i32, i32
  }
  func.func @transform_5(%arg0: i32) -> (i32, i32) {
    %c0_i32 = arith.constant 0 : i32
    %c0_i32_0 = arith.constant 0 : i32
    %c0_i32_1 = arith.constant 0 : i32
    return %c0_i32, %c0_i32_0 : i32, i32
  }
  func.func @transform_6(%arg0: i32) -> (i32, i32) {
    %c0_i32 = arith.constant 0 : i32
    %c0_i32_0 = arith.constant 0 : i32
    %c0_i32_1 = arith.constant 0 : i32
    return %c0_i32, %c0_i32_0 : i32, i32
  }
  func.func @transform_7(%arg0: i32) -> (i32, i32) {
    %c0_i32 = arith.constant 0 : i32
    %c0_i32_0 = arith.constant 0 : i32
    %c0_i32_1 = arith.constant 0 : i32
    return %c0_i32, %c0_i32_0 : i32, i32
  }
  func.func @transform_8(%arg0: i32) -> (i32, i32) {
    %c0_i32 = arith.constant 0 : i32
    %c0_i32_0 = arith.constant 0 : i32
    %c0_i32_1 = arith.constant 0 : i32
    return %c0_i32, %c0_i32_0 : i32, i32
  }
  func.func @transform_9(%arg0: i32) -> (i32, i32) {
    %c0_i32 = arith.constant 0 : i32
    %c0_i32_0 = arith.constant 0 : i32
    return %arg0, %c0_i32 : i32, i32
  }
}

</mosaic_0001>

<bundles_post_ra>
// kernel: qnet_forward.1
= control target key start
LH: loop header
LB: loop body
LE: loop exit
PB: predicated region body
PF: predicated region fallthrough
CT: control target
= control target key end

     0   :  { %s1411_s30 = smov 0   ;;  %s1641_s0 = inlined_call_operand.vmem [shape: f32[64,8], index: 0, kind: input, shape index: {}]   ;;  %s1642_s1 = inlined_call_operand.vmem [shape: bf16[8,128], index: 1, kind: input, shape index: {}]   ;;  %s1643_s2 = inlined_call_operand.vmem [shape: f32[1,128], index: 2, kind: input, shape index: {}]   ;;  %s1644_s3 = inlined_call_operand.vmem [shape: bf16[128,256], index: 3, kind: input, shape index: {}]   ;;  %s1645_s4 = inlined_call_operand.vmem [shape: f32[1,256], index: 4, kind: input, shape index: {}]   ;;  %s1646_s5 = inlined_call_operand.vmem [shape: bf16[256,256], index: 5, kind: input, shape index: {}]   ;;  %s1647_s6 = inlined_call_operand.vmem [shape: f32[1,256], index: 6, kind: input, shape index: {}]   ;;  %s1648_s7 = inlined_call_operand.vmem [shape: bf16[256,128], index: 7, kind: input, shape index: {}]   ;;  %s1649_s8 = inlined_call_operand.vmem [shape: f32[1,128], index: 8, kind: input, shape index: {}]   ;;  %s1650_s9 = inlined_call_operand.vmem [shape: bf16[64,128], index: 9, kind: output, shape index: {}]  }
   0x1 LB: > { %s1119_s10 = sadd.s32 4294967295, %s1358_s30   ;;  %p1123_p0 = scmp.ge.s32.totalorder %s1358_s30, 1  ;;  %s1358_s30 = sphi %s1411_s30, %s19_s30  }
   0x2   : > { %p288_p1 = scmp.lt.s32.totalorder %s1358_s30, 3 }
   0x4   : > { %p289_p2 = pnand %p1123_p0, %p288_p1 }
   0x5   : > { %v343_v0 = vld [vmem:[%s1642_s1] sm:$0xf] (!%p289_p2)  ;;  %vm358_vm0 = vcmask (!%p289_p2), 1043456   ;;  %s1124_s13 = sshll.u32 (!%p289_p2), %s1119_s10, 2  ;;  %v1264_v2 = vld [vmem:[%s1644_s3 + $0x4] ss:$8 sps:$4 sm:$0xff] (!%p289_p2)  }
   0x6   : > { %292 = sbr.rel (%p289_p2) target bundleno = 915 (0x393), region = 56  ;;  %1254 = vmatprep.subr.msk.bf16.mxu0 (!%p289_p2), %vm358_vm0, %v343_v0  ;;  %v360_v1 = vsel (!%p289_p2), %vm358_vm0, %v343_v0, 0  ;;  %p325_p3 = scmp.lt.s32.totalorder (!%p289_p2), %s1124_s13, 7  ;;  %v1266_v3 = vld [vmem:[%s1644_s3] ss:$8 sps:$4 sm:$0xff] (!%p289_p2)   ;;  %525 = vmatprep.subr.bf16.mxu1 (!%p289_p2), %v1264_v2  ;;  %vm351_vm1 = vcmask (!%p289_p2), 64512  }
   0x7   : > { %1249 = vmatpush3.bf16.msra.mxu0 (!%p289_p2), %v360_v1  ;;  %v1267_v4 = vld [vmem:[%s1644_s3 + $0x14] ss:$8 sps:$4 sm:$0xff] (!%p289_p2)   ;;  %526 = vmatpush1.bf16.msra.mxu1 (!%p289_p2), %v1266_v3  ;;  %v1269_v5 = vld [vmem:[%s1644_s3 + $0x10] ss:$8 sps:$4 sm:$0xff] (!%p289_p2)   ;;  %v1270_v6 = vld [vmem:[%s1644_s3 + $0x24] ss:$8 sps:$4 sm:$0xff] (!%p289_p2)  }
   0x8   : > { %527 = vmatprep.subr.bf16.mxu1 (!%p289_p2), %v1267_v4  ;;  %v1272_v12 = vld [vmem:[%s1644_s3 + $0x20] ss:$8 sps:$4 sm:$0xff] (!%p289_p2)   ;;  %v1273_v14 = vld [vmem:[%s1644_s3 + $0x34] ss:$8 sps:$4 sm:$0xff] (!%p289_p2)   ;;  %v1275_v15 = vld [vmem:[%s1644_s3 + $0x30] ss:$8 sps:$4 sm:$0xff] (!%p289_p2)  }
   0x9   : > { %v1276_v16 = vld [vmem:[%s1644_s3 + $0x44] ss:$8 sps:$4 sm:$0xff] (!%p289_p2)   ;;  %v1278_v17 = vld [vmem:[%s1644_s3 + $0x40] ss:$8 sps:$4 sm:$0xff] (!%p289_p2)   ;;  %v1279_v18 = vld [vmem:[%s1644_s3 + $0x54] ss:$8 sps:$4 sm:$0xff] (!%p289_p2)  }
   0xa   : > { %v1281_v19 = vld [vmem:[%s1644_s3 + $0x50] ss:$8 sps:$4 sm:$0xff] (!%p289_p2)   ;;  %v1282_v20 = vld [vmem:[%s1644_s3 + $0x64] ss:$8 sps:$4 sm:$0xff] (!%p289_p2)   ;;  %v1284_v21 = vld [vmem:[%s1644_s3 + $0x60] ss:$8 sps:$4 sm:$0xff] (!%p289_p2)  }
   0xb   : > { %528 = vmatpush1.bf16.msra.mxu1 (!%p289_p2), %v1269_v5  ;;  %v1285_v22 = vld [vmem:[%s1644_s3 + $0x74] ss:$8 sps:$4 sm:$0xff] (!%p289_p2)   ;;  %v1287_v23 = vld [vmem:[%s1644_s3 + $0x70] ss:$8 sps:$4 sm:$0xff] (!%p289_p2)   ;;  %v1360_v24 = vmov (!%p289_p2), 0  }
   0xc   : > { %529 = vmatprep.subr.bf16.mxu1 (!%p289_p2), %v1270_v6  ;;  %557 = vmatprep.mubr.bf16.mxu1 (!%p289_p2), %v1360_v24  ;;  %v1288_v25 = vld [vmem:[%s1646_s5] ss:$8 sps:$4 sm:$0xff] (!%p289_p2)   ;;  %v1290_v26 = vld [vmem:[%s1646_s5 + $0x4] ss:$8 sps:$4 sm:$0xff] (!%p289_p2)   ;;  %v1293_v27 = vld [vmem:[%s1646_s5 + $0x14] ss:$8 sps:$4 sm:$0xff] (!%p289_p2)  }
   0xd   : > { %s1652_s13 = smov (!%p325_p3, %s1124_s13), 7  ;;  %794 = vmatprep.subr.bf16.mxu0 %v1290_v26  ;;  %v1291_v28 = vld [vmem:[%s1646_s5 + $0x10] ss:$8 sps:$4 sm:$0xff]   ;;  %v1296_v29 = vld [vmem:[%s1646_s5 + $0x24] ss:$8 sps:$4 sm:$0xff]  }
   0xe   : > { %s1125_s22 = sshll.u32 %s1652_s13, 3  ;;  %v1294_v30 = vld [vmem:[%s1646_s5 + $0x20] ss:$8 sps:$4 sm:$0xff]   ;;  %v1299_v31 = vld [vmem:[%s1646_s5 + $0x34] ss:$8 sps:$4 sm:$0xff]   ;;  %s1127_s21 = sshll.u32 %s1652_s13, 2 }
   0xf   : > { %s328_s27 = scalar_lea.vmem %s1641_s0, %s1125_s22  ;;  %530 = vmatpush1.bf16.msra.mxu1 %v1272_v12  ;;  %v1297_v32 = vld [vmem:[%s1646_s5 + $0x30] ss:$8 sps:$4 sm:$0xff]   ;;  %v1302_v33 = vld [vmem:[%s1646_s5 + $0x44] ss:$8 sps:$4 sm:$0xff]   ;;  %v1300_v34 = vld [vmem:[%s1646_s5 + $0x40] ss:$8 sps:$4 sm:$0xff]   ;;  %s334_s24 = scalar_lea.vmem %s1650_s9, %s1127_s21 }
  0x10   : > { %v337_v7 = vld [vmem:[%s328_s27] sm:$0xff]  ;;  %v338_v8 = vld [vmem:[%s328_s27 + $0x8] sm:$0xff]  ;;  %v339_v9 = vld [vmem:[%s328_s27 + $0x10] sm:$0xff]  ;;  %531 = vmatprep.subr.bf16.mxu1 %v1273_v14 }
  0x11   : > { %v341_v10 = vpack.c.bf16 %v338_v8, %v337_v7  ;;  %v340_v11 = vld [vmem:[%s328_s27 + $0x18] sm:$0xff]  ;;  %v1308_v37 = vld [vmem:[%s1646_s5 + $0x64] ss:$8 sps:$4 sm:$0xff]   ;;  %v1306_v38 = vld [vmem:[%s1646_s5 + $0x60] ss:$8 sps:$4 sm:$0xff]  }
  0x12   : > { %v342_v13 = vpack.c.bf16 %v340_v11, %v339_v9  ;;  %v1305_v35 = vld [vmem:[%s1646_s5 + $0x54] ss:$8 sps:$4 sm:$0xff]   ;;  %v1303_v36 = vld [vmem:[%s1646_s5 + $0x50] ss:$8 sps:$4 sm:$0xff]   ;;  %v1314_v41 = vld [vmem:[%s1646_s5 + $0x84] ss:$8 sps:$4 sm:$0xff]  }
  0x13   : > { %1250 = vmatprep.mubr.msk.bf16.mxu0 %vm351_vm1, %v341_v10  ;;  %532 = vmatpush1.bf16.msra.mxu1 %v1275_v15  ;;  %v1311_v39 = vld [vmem:[%s1646_s5 + $0x74] ss:$8 sps:$4 sm:$0xff]   ;;  %v1309_v40 = vld [vmem:[%s1646_s5 + $0x70] ss:$8 sps:$4 sm:$0xff]   ;;  %v1312_v42 = vld [vmem:[%s1646_s5 + $0x80] ss:$8 sps:$4 sm:$0xff]  }
  0x14   : > { %1251 = vmatmul.mubr.msk.bf16.vlgmr.msra.gmra.mrb[0].mxu0 %vm351_vm1, %v342_v13  ;;  %533 = vmatprep.subr.bf16.mxu1 %v1276_v16  ;;  %v1317_v43 = vld [vmem:[%s1646_s5 + $0x94] ss:$8 sps:$4 sm:$0xff]   ;;  %v1315_v44 = vld [vmem:[%s1646_s5 + $0x90] ss:$8 sps:$4 sm:$0xff]   ;;  %v1320_v45 = vld [vmem:[%s1646_s5 + $0xa4] ss:$8 sps:$4 sm:$0xff]  }
  0x15   : > { %795 = vmatpush1.bf16.msra.mxu0 %v1288_v25  ;;  %v1318_v46 = vld [vmem:[%s1646_s5 + $0xa0] ss:$8 sps:$4 sm:$0xff]   ;;  %v1323_v47 = vld [vmem:[%s1646_s5 + $0xb4] ss:$8 sps:$4 sm:$0xff]   ;;  %v1321_v48 = vld [vmem:[%s1646_s5 + $0xb0] ss:$8 sps:$4 sm:$0xff]  }
  0x16   : > { %796 = vmatprep.subr.bf16.mxu0 %v1293_v27  ;;  %v1326_v49 = vld [vmem:[%s1646_s5 + $0xc4] ss:$8 sps:$4 sm:$0xff]   ;;  %v1324_v50 = vld [vmem:[%s1646_s5 + $0xc0] ss:$8 sps:$4 sm:$0xff]   ;;  %v1329_v51 = vld [vmem:[%s1646_s5 + $0xd4] ss:$8 sps:$4 sm:$0xff]  }
  0x17   : > { %534 = vmatpush1.bf16.msra.mxu1 %v1278_v17  ;;  %v1327_v52 = vld [vmem:[%s1646_s5 + $0xd0] ss:$8 sps:$4 sm:$0xff]   ;;  %v1128_v53 = vld [vmem:[%s1643_s2] ss:$0 sm:$0xff]  ;;  %v1332_v4 = vld [vmem:[%s1646_s5 + $0xe4] ss:$8 sps:$4 sm:$0xff]  }
  0x18   : > { %535 = vmatprep.subr.bf16.mxu1 %v1279_v18  ;;  %v1330_v5 = vld [vmem:[%s1646_s5 + $0xe0] ss:$8 sps:$4 sm:$0xff]   ;;  %v1335_v6 = vld [vmem:[%s1646_s5 + $0xf4] ss:$8 sps:$4 sm:$0xff]   ;;  %v1333_v7 = vld [vmem:[%s1646_s5 + $0xf0] ss:$8 sps:$4 sm:$0xff]  }
  0x19   : > { %797 = vmatpush1.bf16.msra.mxu0 %v1291_v28  ;;  %v1336_v8 = vld [vmem:[%s1648_s7 + $0x40] sm:$0xff]   ;;  %v1338_v10 = vld [vmem:[%s1648_s7 + $0x48] sm:$0xff]   ;;  %v1340_v12 = vld [vmem:[%s1648_s7 + $0x50] sm:$0xff]  }
  0x1a   : > { %798 = vmatprep.subr.bf16.mxu0 %v1296_v29  ;;  %v1337_v9 = vld [vmem:[%s1648_s7] sm:$0xff]   ;;  %v1339_v11 = vld [vmem:[%s1648_s7 + $0x8] sm:$0xff]   ;;  %v1341_v13 = vld [vmem:[%s1648_s7 + $0x10] sm:$0xff]  }
  0x1b   : > { %536 = vmatpush1.bf16.msra.mxu1 %v1281_v19  ;;  %v1342_v14 = vld [vmem:[%s1648_s7 + $0x58] sm:$0xff]   ;;  %v1344_v16 = vld [vmem:[%s1648_s7 + $0x60] sm:$0xff]   ;;  %v1346_v18 = vld [vmem:[%s1648_s7 + $0x68] sm:$0xff]   ;;  %v435_v19 = vlaneseq }
  0x1c   : > { %537 = vmatprep.subr.bf16.mxu1 %v1282_v20  ;;  %v1343_v15 = vld [vmem:[%s1648_s7 + $0x18] sm:$0xff]   ;;  %v1345_v17 = vld [vmem:[%s1648_s7 + $0x20] sm:$0xff]  }
  0x1d   : > { %799 = vmatpush1.bf16.msra.mxu0 %v1294_v30  ;;  %v436_v20 = vshrl.u32 %v435_v19, 7 }
  0x1e   : > { %800 = vmatprep.subr.bf16.mxu0 %v1299_v31 }
  0x1f   : > { %538 = vmatpush1.bf16.msra.mxu1 %v1284_v21  ;;  %v437_v21 = vsub.s32 0, %v436_v20 }
  0x20   : > { %539 = vmatprep.subr.bf16.mxu1 %v1285_v22  ;;  %v433_v22 = vld [vmem:[%s1645_s4] sm:$0x3] }
  0x21   : > { %801 = vmatpush1.bf16.msra.mxu0 %v1297_v32 }
  0x22   : > { %802 = vmatprep.subr.bf16.mxu0 %v1302_v33 }
  0x23   : > { %540 = vmatpush1.bf16.msra.mxu1 %v1287_v23  ;;  %v441_v23 = vsub.s32 1, %v436_v20 }
  0x24   : > { %1220 = vmatprep.subr.bf16.mxu1 %v1336_v8 }
  0x25   : > { %803 = vmatpush1.bf16.msra.mxu0 %v1300_v34  ;;  %v442_v25 = vrot.slane %v433_v22, %v441_v23 }
  0x26   : > { %804 = vmatprep.subr.bf16.mxu0 %v1305_v35 }
  0x29   : > { %805 = vmatpush1.bf16.msra.mxu0 %v1303_v36 }
  0x2a   : > { %806 = vmatprep.subr.bf16.mxu0 %v1308_v37 }
  0x2d   : > { %807 = vmatpush1.bf16.msra.mxu0 %v1306_v38 }
  0x2e   : > { %808 = vmatprep.subr.bf16.mxu0 %v1311_v39 }
  0x31   : > { %809 = vmatpush1.bf16.msra.mxu0 %v1309_v40 }
  0x32   : > { %810 = vmatprep.subr.bf16.mxu0 %v1314_v41 }
  0x35   : > { %811 = vmatpush1.bf16.msra.mxu0 %v1312_v42 }
  0x36   : > { %812 = vmatprep.subr.bf16.mxu0 %v1317_v43 }
  0x39   : > { %813 = vmatpush1.bf16.msra.mxu0 %v1315_v44 }
  0x3a   : > { %814 = vmatprep.subr.bf16.mxu0 %v1320_v45 }
  0x3d   : > { %815 = vmatpush1.bf16.msra.mxu0 %v1318_v46 }
  0x3e   : > { %816 = vmatprep.subr.bf16.mxu0 %v1323_v47 }
  0x41   : > { %817 = vmatpush1.bf16.msra.mxu0 %v1321_v48 }
  0x42   : > { %818 = vmatprep.subr.bf16.mxu0 %v1326_v49 }
  0x45   : > { %819 = vmatpush1.bf16.msra.mxu0 %v1324_v50 }
  0x46   : > { %820 = vmatprep.subr.bf16.mxu0 %v1329_v51 }
  0x49   : > { %821 = vmatpush1.bf16.msra.mxu0 %v1327_v52 }
  0x4a   : > { %822 = vmatprep.subr.bf16.mxu0 %v1332_v4 }
  0x4d   : > { %823 = vmatpush1.bf16.msra.mxu0 %v1330_v5 }
  0x4e   : > { %824 = vmatprep.subr.bf16.mxu0 %v1335_v6 }
  0x51   : > { %825 = vmatpush1.bf16.msra.mxu0 %v1333_v7 }
  0xe7   : > { %v1252_v54 = vpop.f32.mrb[0].mxu0 }
  0xe8   : > { %v405_v55 = vadd.f32 %v1252_v54, %v1128_v53  ;;  %v396_v56 = vpop.f32.mrb[1].mxu0  ;;  %v1347_v54 = vld [vmem:[%s1648_s7 + $0x28] sm:$0xff]  }
  0xe9   : > { %v397_v57 = vadd.f32 %v1128_v53, %v396_v56  ;;  %v1253_v58 = vpop.f32.mrb[2].mxu0  ;;  %v1349_v56 = vld [vmem:[%s1648_s7 + $0x30] sm:$0xff]  }
  0xea   : > { %v408_v59 = vadd.f32 %v1253_v58, %v1128_v53  ;;  %v399_v60 = vpop.f32.mrb[3].mxu0  ;;  %v413_v62 = vmax.f32 %v405_v55, 0.0  ;;  %v1348_v55 = vld [vmem:[%s1648_s7 + $0x70] sm:$0xff]   ;;  %v1351_v58 = vld [vmem:[%s1648_s7 + $0x38] sm:$0xff]  }
  0xeb   : > { %v400_v61 = vadd.f32 %v1128_v53, %v399_v60  ;;  %v411_v0 = vmax.f32 %v397_v57, 0.0  ;;  %v1350_v57 = vld [vmem:[%s1648_s7 + $0x78] sm:$0xff]  }
  0xec   : > { %v414_v63 = vmax.f32 %v408_v59, 0.0  ;;  %v622_v59 = vld [vmem:[%s1647_s6] sm:$0x3] }
  0xed   : > { %v412_v1 = vmax.f32 %v400_v61, 0.0  ;;  %v627_v60 = vrot.slane %v622_v59, %v437_v21  ;;  %v631_v61 = vrot.slane %v622_v59, %v441_v23 }
  0xee   : > { %v416_v2 = vpack.c.bf16 %v414_v63, %v413_v62 }
  0xef   : > { %v415_v3 = vpack.c.bf16 %v412_v1, %v411_v0 }
  0xf1   : > { %558 = vmatmul.mubr.bf16.vlgmr.msra.gmra.mrb[0].mxu1 %v415_v3 }
  0xf2   : > { %567 = vmatprep.mubr.bf16.mxu1 %v1360_v24  ;;  %1221 = vmatpush3.bf16.msra.mxu1 %v1337_v9  ;;  %v438_v24 = vrot.slane %v433_v22, %v437_v21 }
  0xf3   : > { %1222 = vmatprep.subr.bf16.mxu1 %v1338_v10 }
  0xf6   : > { %1223 = vmatpush3.bf16.msra.mxu1 %v1339_v11 }
  0xf7   : > { %1224 = vmatprep.subr.bf16.mxu1 %v1340_v12 }
  0xf9   : > { %568 = vmatmul.mubr.bf16.gmra.mrb[4].mxu1 %v416_v2 }
  0xfa   : > { %1225 = vmatpush3.bf16.msra.mxu1 %v1341_v13 }
  0xfb   : > { %1226 = vmatprep.subr.bf16.mxu1 %v1342_v14 }
  0xfe   : > { %1227 = vmatpush3.bf16.msra.mxu1 %v1343_v15 }
  0xff   : > { %1228 = vmatprep.subr.bf16.mxu1 %v1344_v16 }
 0x102   : > { %1229 = vmatpush3.bf16.msra.mxu1 %v1345_v17 }
 0x103   : > { %1230 = vmatprep.subr.bf16.mxu1 %v1346_v18 }
 0x106   : > { %1231 = vmatpush3.bf16.msra.mxu1 %v1347_v54 }
 0x107   : > { %1232 = vmatprep.subr.bf16.mxu1 %v1348_v55 }
 0x10a   : > { %1233 = vmatpush3.bf16.msra.mxu1 %v1349_v56 }
 0x10b   : > { %1234 = vmatprep.subr.bf16.mxu1 %v1350_v57 }
 0x10e   : > { %1235 = vmatpush3.bf16.msra.mxu1 %v1351_v58 }
 0x1c4   : > { %v559_v26 = vpop.f32.mrb[0].mxu1 }
 0x1c5   : > { %v560_v27 = vadd.f32 %v559_v26, %v438_v24  ;;  %v561_v28 = vpop.f32.mrb[1].mxu1 }
 0x1c6   : > { %v562_v29 = vadd.f32 %v561_v28, %v442_v25  ;;  %v563_v30 = vpop.f32.mrb[2].mxu1 }
 0x1c7   : > { %v564_v31 = vadd.f32 %v563_v30, %v438_v24  ;;  %v565_v32 = vpop.f32.mrb[3].mxu1  ;;  %v578_v34 = vmax.f32 %v560_v27, 0.0  ;;  %v1179_v30 = vld [vmem:[%s1649_s8] ss:$0 sm:$0xff] }
 0x1c8   : > { %v566_v33 = vadd.f32 %v565_v32, %v442_v25  ;;  %v579_v36 = vmax.f32 %v562_v29, 0.0 }
 0x1c9   : > { %v580_v35 = vmax.f32 %v564_v31, 0.0 }
 0x1ca   : > { %v581_v37 = vmax.f32 %v566_v33, 0.0 }
 0x1cb   : > { %v586_v38 = vpack.c.bf16 %v580_v35, %v578_v34 }
 0x1cc   : > { %v587_v39 = vpack.c.bf16 %v581_v37, %v579_v36  ;;  %v569_v40 = vpop.f32.mrb[4].mxu1 }
 0x1cd   : > { %v570_v41 = vadd.f32 %v569_v40, %v438_v24  ;;  %v571_v42 = vpop.f32.mrb[5].mxu1 }
 0x1ce   : > { %v572_v43 = vadd.f32 %v571_v42, %v442_v25  ;;  %v573_v44 = vpop.f32.mrb[6].mxu1  ;;  %826 = vmatprep.mubr.bf16.mxu0 %v587_v39 }
 0x1cf   : > { %v574_v45 = vadd.f32 %v573_v44, %v438_v24  ;;  %v575_v46 = vpop.f32.mrb[7].mxu1  ;;  %827 = vmatmul.mubr.bf16.vlgmr.msra.gmra.mrb[4].mxu0 %v586_v38  ;;  %v582_v48 = vmax.f32 %v570_v41, 0.0 }
 0x1d0   : > { %v576_v47 = vadd.f32 %v575_v46, %v442_v25  ;;  %v583_v50 = vmax.f32 %v572_v43, 0.0 }
 0x1d1   : > { %v584_v49 = vmax.f32 %v574_v45, 0.0 }
 0x1d2   : > { %v585_v51 = vmax.f32 %v576_v47, 0.0 }
 0x1d3   : > { %v588_v52 = vpack.c.bf16 %v584_v49, %v582_v48 }
 0x1d4   : > { %v589_v53 = vpack.c.bf16 %v585_v51, %v583_v50 }
 0x1d6   : > { %836 = vmatprep.mubr.bf16.mxu0 %v589_v53 }
 0x1d7   : > { %837 = vmatmul.mubr.bf16.gmra.mrb[8].mxu0 %v588_v52 }
 0x2a2   : > { %v828_v62 = vpop.f32.mrb[4].mxu0 }
 0x2a3   : > { %v829_v63 = vadd.f32 %v828_v62, %v627_v60  ;;  %v830_v0 = vpop.f32.mrb[5].mxu0 }
 0x2a4   : > { %v831_v1 = vadd.f32 %v830_v0, %v631_v61  ;;  %v832_v2 = vpop.f32.mrb[6].mxu0 }
 0x2a5   : > { %v833_v3 = vadd.f32 %v832_v2, %v627_v60  ;;  %v834_v4 = vpop.f32.mrb[7].mxu0  ;;  %v847_v6 = vmax.f32 %v829_v63, 0.0 }
 0x2a6   : > { %v835_v5 = vadd.f32 %v834_v4, %v631_v61  ;;  %v848_v8 = vmax.f32 %v831_v1, 0.0 }
 0x2a7   : > { %v849_v7 = vmax.f32 %v833_v3, 0.0 }
 0x2a8   : > { %v850_v9 = vmax.f32 %v835_v5, 0.0 }
 0x2a9   : > { %v855_v10 = vpack.c.bf16 %v849_v7, %v847_v6 }
 0x2aa   : > { %v856_v11 = vpack.c.bf16 %v850_v9, %v848_v8  ;;  %v838_v12 = vpop.f32.mrb[8].mxu0 }
 0x2ab   : > { %v839_v13 = vadd.f32 %v838_v12, %v627_v60  ;;  %v840_v14 = vpop.f32.mrb[9].mxu0 }
 0x2ac   : > { %v841_v15 = vadd.f32 %v840_v14, %v631_v61  ;;  %v842_v16 = vpop.f32.mrb[10].mxu0  ;;  %1026 = vmatprep.mubr.bf16.mxu1 %v856_v11 }
 0x2ad   : > { %v843_v17 = vadd.f32 %v842_v16, %v627_v60  ;;  %v844_v18 = vpop.f32.mrb[11].mxu0  ;;  %1027 = vmatmul.mubr.bf16.vlgmr.msra.gmra.mrb[8].mxu1 %v855_v10  ;;  %v851_v20 = vmax.f32 %v839_v13, 0.0 }
 0x2ae   : > { %v845_v19 = vadd.f32 %v844_v18, %v631_v61  ;;  %v852_v22 = vmax.f32 %v841_v15, 0.0 }
 0x2af   : > { %v853_v21 = vmax.f32 %v843_v17, 0.0 }
 0x2b0   : > { %v854_v23 = vmax.f32 %v845_v19, 0.0 }
 0x2b1   : > { %v857_v24 = vpack.c.bf16 %v853_v21, %v851_v20 }
 0x2b2   : > { %v858_v25 = vpack.c.bf16 %v854_v23, %v852_v22 }
 0x2b4   : > { %1034 = vmatprep.mubr.bf16.mxu1 %v858_v25 }
 0x2b5   : > { %1035 = vmatmul.mubr.bf16.gmra.mrb[12].mxu1 %v857_v24 }
 0x380   : > { %v1236_v26 = vpop.f32.mrb[8].mxu1 }
 0x381   : > { %v1237_v27 = vpop.f32.mrb[9].mxu1 }
 0x382   : > { %v1238_v28 = vadd.f32 %v1237_v27, %v1236_v26  ;;  %v1239_v29 = vpop.f32.mrb[10].mxu1 }
 0x383   : > { %v1240_v31 = vpop.f32.mrb[11].mxu1 }
 0x384   : > { %v1241_v32 = vadd.f32 %v1240_v31, %v1239_v29  ;;  %v1029_v33 = vadd.f32 %v1238_v28, %v1179_v30 }
 0x386   : > { %v1032_v34 = vadd.f32 %v1241_v32, %v1179_v30 }
 0x388   : > { %v1209_v35 = vpack.c.bf16 %v1032_v34, %v1029_v33  ;;  %v1242_v36 = vpop.f32.mrb[12].mxu1 }
 0x389   : > { %v1243_v37 = vpop.f32.mrb[13].mxu1 }
 0x38a   : > { %1210 = vst [vmem:[%s334_s24] sm:$0xff] %v1209_v35   ;;  %v1244_v38 = vadd.f32 %v1243_v37, %v1242_v36  ;;  %v1245_v39 = vpop.f32.mrb[14].mxu1 }
 0x38b   : > { %v1246_v40 = vpop.f32.mrb[15].mxu1 }
 0x38c   : > { %v1247_v41 = vadd.f32 %v1246_v40, %v1245_v39  ;;  %v1037_v42 = vadd.f32 %v1244_v38, %v1179_v30 }
 0x38e   : > { %v1040_v43 = vadd.f32 %v1247_v41, %v1179_v30 }
 0x390   : > { %v1214_v44 = vpack.c.bf16 %v1040_v43, %v1037_v42 }
 0x392   : > { %1216 = vst [vmem:[%s334_s24 + $0x8] sm:$0xff] %v1214_v44  }
 0x393 PF: > { %s19_s30 = sadd.s32 1, %s1358_s30  }
 0x394   : > { %p16_p4 = scmp.ge.s32.totalorder %s19_s30, 4  }
 0x396   :  { %18 = sbr.rel (!%p16_p4) target bundleno = 1 (0x1), region = 86 }

</bundles_post_ra>
